<compile_context>
chip_gen: v7x
topology: tpu7x:2x2x1
jax: 0.10.0
libtpu: 0.0.40
codegen_flags: <defaults>
</compile_context>

<pallas_src>
import jax
import jax.numpy as jnp
from jax.experimental import pallas as pl
from jax.experimental.pallas import tpu as pltpu

H_SIZE = 256  # hidden width of the actor MLP (matches the module's h_size)


def _round_up(n, m):
    return ((n + m - 1) // m) * m


def mlp_actor_kernel(x_ref, w0_ref, wmid_ref, w3_ref, b_ref, y_ref):
    """One batch tile through the whole actor MLP.

    x_ref:    [TB, OBS]   bf16 input tile (OBS = obs_dim, maybe padded to 16)
    w0_ref:   [OBS, H]    bf16 layer-0 weight (y = x @ W + b layout)
    wmid_ref: [2, H, H]   bf16 layers 1-2 weights
    w3_ref:   [H, OUT]    bf16 layer-3 weight (OUT = action_dim padded to 128)
    b_ref:    [4, H]      f32 biases (row 3 only uses the first OUT lanes)
    y_ref:    [TB, OUT]   f32 lane-dense output (cols >= action_dim are zero)
    """
    out_w = w3_ref.shape[1]
    b = b_ref[...]                                   # hoist all biases once (f32)

    # Layer 0: [TB, OBS] @ [OBS, H]  (bf16 operands, f32 accumulate)
    h = jnp.dot(x_ref[...], w0_ref[...],
                preferred_element_type=jnp.float32) + b[0:1, :]
    h = jnp.maximum(h, 0.0)

    # Layers 1-2: [TB, H] @ [H, H]
    h = jnp.dot(h.astype(jnp.bfloat16), wmid_ref[0],
                preferred_element_type=jnp.float32) + b[1:2, :]
    h = jnp.maximum(h, 0.0)
    h = jnp.dot(h.astype(jnp.bfloat16), wmid_ref[1],
                preferred_element_type=jnp.float32) + b[2:3, :]
    h = jnp.maximum(h, 0.0)

    # Layer 3: [TB, H] @ [H, OUT] -> tanh.  Padded output columns have zero
    # weights and zero bias, so tanh(0) = 0 there; the wrapper slices them away.
    y = jnp.dot(h.astype(jnp.bfloat16), w3_ref[...],
                preferred_element_type=jnp.float32) + b[3:4, :out_w]
    y_ref[...] = jnp.tanh(y)


def make_controller_params(obs_dim, action_dim, h=H_SIZE, seed=0):
    """Deterministic synthetic parameters (orthogonal init is init-time only).

    Returns:
      packed = (w0 [OBS,h] bf16, wmid [2,h,h] bf16, w3 [h,OUT] bf16, b [4,h] f32)
      raw    = list of unpadded f32 (w, b) pairs (for reference checks)
    """
    assert action_dim <= h, "bias packing assumes action_dim <= h"
    OBS = _round_up(obs_dim, 16)            # bf16 sublane-friendly; 64 -> 64 (no pad)
    OUT = _round_up(action_dim, 128)        # one lane row; 32 -> 128
    assert OUT <= h

    dims = [(obs_dim, h), (h, h), (h, h), (h, action_dim)]
    key = jax.random.PRNGKey(seed)
    ws, bs = [], []
    for di, do in dims:
        key, kw, kb = jax.random.split(key, 3)
        ws.append(jax.random.normal(kw, (di, do), jnp.float32)
                  / jnp.sqrt(jnp.float32(di)))
        bs.append(jax.random.normal(kb, (do,), jnp.float32) * 0.01)

    w0 = jnp.zeros((OBS, h), jnp.float32).at[:obs_dim, :].set(ws[0]).astype(jnp.bfloat16)
    wmid = jnp.stack([ws[1], ws[2]]).astype(jnp.bfloat16)
    w3 = jnp.zeros((h, OUT), jnp.float32).at[:, :action_dim].set(ws[3]).astype(jnp.bfloat16)
    b = jnp.zeros((4, h), jnp.float32)
    for li, bvec in enumerate(bs):
        b = b.at[li, :bvec.shape[0]].set(bvec)
    return (w0, wmid, w3, b), list(zip(ws, bs))


def controller_forward(x, params, action_dim, tb=None):
    """Run the actor MLP on x: [B, obs_dim] -> [B, action_dim] (f32)."""
    w0, wmid, w3, b = params
    B, obs_dim = x.shape
    OBS, H = w0.shape
    OUT = w3.shape[1]

    xh = x.astype(jnp.bfloat16)
    if OBS != obs_dim:                       # no-op for obs_dim already 16-aligned
        xh = jnp.pad(xh, ((0, 0), (0, OBS - obs_dim)))

    # Batch tile: small batches -> one tile (grid=(1,)); large batches -> tb=512
    # so v7x's two TensorCores each get >= 1 "parallel" grid step.  Even at
    # tb=1024 total VMEM (x+y double-buffered + ~0.4 MiB weights) is a few MiB.
    if tb is None:
        tb = _round_up(B, 16) if B <= 512 else 512
    tb = max(16, _round_up(tb, 16))
    Bp = _round_up(B, tb)
    if Bp != B:
        xh = jnp.pad(xh, ((0, Bp - B), (0, 0)))
    grid = (Bp // tb,)

    cost = pl.CostEstimate(
        flops=int(2 * Bp * (OBS * H + 2 * H * H + H * OUT)),
        transcendentals=int(Bp * OUT),
        bytes_accessed=int((w0.size + wmid.size + w3.size) * 2 + b.size * 4
                           + Bp * OBS * 2 + Bp * OUT * 4),
    )

    def _const_spec(shape):
        # Constant index_map -> stays VMEM-resident across batch tiles; single
        # buffer is enough, so drop the second pipeline buffer.
        return pl.BlockSpec(shape, lambda i: (0,) * len(shape),
                            pipeline_mode=pl.Buffered(1))

    y = pl.pallas_call(
        mlp_actor_kernel,
        out_shape=jax.ShapeDtypeStruct((Bp, OUT), jnp.float32),
        grid=grid,
        in_specs=[
            pl.BlockSpec((tb, OBS), lambda i: (i, 0)),   # batch tile of x (bf16)
            _const_spec((OBS, H)),                       # layer-0 weight
            _const_spec((2, H, H)),                      # layers 1-2 weights
            _const_spec((H, OUT)),                       # layer-3 weight
            _const_spec((4, H)),                         # biases (f32)
        ],
        out_specs=pl.BlockSpec((tb, OUT), lambda i: (i, 0)),
        compiler_params=pltpu.CompilerParams(
            dimension_semantics=("parallel",)),
        cost_estimate=cost,
    )(xh, w0, wmid, w3, b)

    # Lane-dense slab -> real batch / action_dim.
    return y[:B, :action_dim]


if __name__ == "__main__":
    # Module-consistent small shapes: observation_dim=64, action_dim=32, batch=16.
    obs_dim, act_dim, batch = 64, 32, 16

    params, _raw = make_controller_params(obs_dim, act_dim, seed=0)

    key = jax.random.PRNGKey(0)
    x = jax.random.normal(key, (batch, obs_dim), jnp.float32)

    y = controller_forward(x, params, act_dim)          # default tb -> grid=(1,)
    jax.block_until_ready(y)

    # Pure-JAX f32 reference using the same bf16-rounded weights
    # (Linear+ReLU x3, Linear+Tanh).  Remaining delta is bf16 activation rounding.
    w0f = params[0].astype(jnp.float32)[:obs_dim, :]
    w1f = params[1][0].astype(jnp.float32)
    w2f = params[1][1].astype(jnp.float32)
    w3f = params[2].astype(jnp.float32)[:, :act_dim]
    bf = params[3]
    h_ref = jnp.maximum(x @ w0f + bf[0], 0.0)
    h_ref = jnp.maximum(h_ref @ w1f + bf[1], 0.0)
    h_ref = jnp.maximum(h_ref @ w2f + bf[2], 0.0)
    y_ref = jnp.tanh(h_ref @ w3f + bf[3, :act_dim])

    assert y.shape == (batch, act_dim), "output shape mismatch"
    assert jnp.allclose(y, y_ref, atol=2e-2), "actor output mismatch"

    print("KERNEL_OK")
</pallas_src>

<mosaic_0001>
module attributes {stable_mosaic.version = 11 : i64} {
  func.func @mlp_actor_kernel(%arg0: i32, %arg1: memref<16x64xbf16, #tpu.memory_space<vmem>>, %arg2: memref<64x256xbf16, #tpu.memory_space<vmem>>, %arg3: memref<2x256x256xbf16, #tpu.memory_space<vmem>>, %arg4: memref<256x128xbf16, #tpu.memory_space<vmem>>, %arg5: memref<4x256xf32, #tpu.memory_space<vmem>>, %arg6: memref<16x128xf32, #tpu.memory_space<vmem>>) attributes {dimension_semantics = [#tpu.dimension_semantics<parallel>], iteration_bounds = array<i64: 1>, scalar_prefetch = 0 : i64, scratch_operands = 0 : i64, tpu.core_type = #tpu.core_type<tc>, window_params = [{transform_indices = @transform_0, window_bounds = array<i64: 16, 64>}, {pipeline_mode = #tpu.pipeline_mode<synchronous>, transform_indices = @transform_1, window_bounds = array<i64: 64, 256>}, {pipeline_mode = #tpu.pipeline_mode<synchronous>, transform_indices = @transform_2, window_bounds = array<i64: 2, 256, 256>}, {pipeline_mode = #tpu.pipeline_mode<synchronous>, transform_indices = @transform_3, window_bounds = array<i64: 256, 128>}, {pipeline_mode = #tpu.pipeline_mode<synchronous>, transform_indices = @transform_4, window_bounds = array<i64: 4, 256>}, {transform_indices = @transform_5, window_bounds = array<i64: 16, 128>}]} {
    %c0 = arith.constant 0 : index
    %c0_0 = arith.constant 0 : index
    %0 = vector.load %arg5[%c0, %c0_0] : memref<4x256xf32, #tpu.memory_space<vmem>>, vector<4x256xf32>
    %c0_1 = arith.constant 0 : index
    %c0_2 = arith.constant 0 : index
    %1 = vector.load %arg1[%c0_1, %c0_2] : memref<16x64xbf16, #tpu.memory_space<vmem>>, vector<16x64xbf16>
    %c0_3 = arith.constant 0 : index
    %c0_4 = arith.constant 0 : index
    %2 = vector.load %arg2[%c0_3, %c0_4] : memref<64x256xbf16, #tpu.memory_space<vmem>>, vector<64x256xbf16>
    %cst = arith.constant dense<0.000000e+00> : vector<16x256xf32>
    %3 = tpu.matmul %1, %2, %cst {dimension_numbers = #tpu.dot_dimension_numbers<[1], [0], [0], [1], [0, 0, 1, 1], [], []>} : vector<16x64xbf16>, vector<64x256xbf16>, vector<16x256xf32> -> vector<16x256xf32>
    %4 = vector.extract_strided_slice %0 {offsets = [0, 0], sizes = [1, 256], strides = [1, 1]} : vector<4x256xf32> to vector<1x256xf32>
    %5 = vector.broadcast %4 : vector<1x256xf32> to vector<16x256xf32>
    %6 = arith.addf %3, %5 : vector<16x256xf32>
    %cst_5 = arith.constant 0.000000e+00 : f32
    %7 = vector.broadcast %cst_5 : f32 to vector<16x256xf32>
    %8 = arith.maximumf %6, %7 : vector<16x256xf32>
    %9 = arith.truncf %8 : vector<16x256xf32> to vector<16x256xbf16>
    %c0_6 = arith.constant 0 : index
    %c0_7 = arith.constant 0 : index
    %c0_8 = arith.constant 0 : index
    %10 = vector.load %arg3[%c0_6, %c0_7, %c0_8] : memref<2x256x256xbf16, #tpu.memory_space<vmem>>, vector<1x256x256xbf16>
    %11 = vector.shape_cast %10 : vector<1x256x256xbf16> to vector<256x256xbf16>
    %cst_9 = arith.constant dense<0.000000e+00> : vector<16x256xf32>
    %12 = tpu.matmul %9, %11, %cst_9 {dimension_numbers = #tpu.dot_dimension_numbers<[1], [0], [0], [1], [0, 0, 1, 1], [], []>} : vector<16x256xbf16>, vector<256x256xbf16>, vector<16x256xf32> -> vector<16x256xf32>
    %13 = vector.extract_strided_slice %0 {offsets = [1, 0], sizes = [1, 256], strides = [1, 1]} : vector<4x256xf32> to vector<1x256xf32>
    %14 = vector.broadcast %13 : vector<1x256xf32> to vector<16x256xf32>
    %15 = arith.addf %12, %14 : vector<16x256xf32>
    %cst_10 = arith.constant 0.000000e+00 : f32
    %16 = vector.broadcast %cst_10 : f32 to vector<16x256xf32>
    %17 = arith.maximumf %15, %16 : vector<16x256xf32>
    %18 = arith.truncf %17 : vector<16x256xf32> to vector<16x256xbf16>
    %c1 = arith.constant 1 : index
    %c0_11 = arith.constant 0 : index
    %c0_12 = arith.constant 0 : index
    %19 = vector.load %arg3[%c1, %c0_11, %c0_12] : memref<2x256x256xbf16, #tpu.memory_space<vmem>>, vector<1x256x256xbf16>
    %20 = vector.shape_cast %19 : vector<1x256x256xbf16> to vector<256x256xbf16>
    %cst_13 = arith.constant dense<0.000000e+00> : vector<16x256xf32>
    %21 = tpu.matmul %18, %20, %cst_13 {dimension_numbers = #tpu.dot_dimension_numbers<[1], [0], [0], [1], [0, 0, 1, 1], [], []>} : vector<16x256xbf16>, vector<256x256xbf16>, vector<16x256xf32> -> vector<16x256xf32>
    %22 = vector.extract_strided_slice %0 {offsets = [2, 0], sizes = [1, 256], strides = [1, 1]} : vector<4x256xf32> to vector<1x256xf32>
    %23 = vector.broadcast %22 : vector<1x256xf32> to vector<16x256xf32>
    %24 = arith.addf %21, %23 : vector<16x256xf32>
    %cst_14 = arith.constant 0.000000e+00 : f32
    %25 = vector.broadcast %cst_14 : f32 to vector<16x256xf32>
    %26 = arith.maximumf %24, %25 : vector<16x256xf32>
    %27 = arith.truncf %26 : vector<16x256xf32> to vector<16x256xbf16>
    %c0_15 = arith.constant 0 : index
    %c0_16 = arith.constant 0 : index
    %28 = vector.load %arg4[%c0_15, %c0_16] : memref<256x128xbf16, #tpu.memory_space<vmem>>, vector<256x128xbf16>
    %cst_17 = arith.constant dense<0.000000e+00> : vector<16x128xf32>
    %29 = tpu.matmul %27, %28, %cst_17 {dimension_numbers = #tpu.dot_dimension_numbers<[1], [0], [0], [1], [0, 0, 1, 1], [], []>} : vector<16x256xbf16>, vector<256x128xbf16>, vector<16x128xf32> -> vector<16x128xf32>
    %30 = vector.extract_strided_slice %0 {offsets = [3, 0], sizes = [1, 128], strides = [1, 1]} : vector<4x256xf32> to vector<1x128xf32>
    %31 = vector.broadcast %30 : vector<1x128xf32> to vector<16x128xf32>
    %32 = arith.addf %29, %31 : vector<16x128xf32>
    %33 = math.tanh %32 : vector<16x128xf32>
    %c0_18 = arith.constant 0 : index
    %c0_19 = arith.constant 0 : index
    %34 = vector.load %arg6[%c0_18, %c0_19] : memref<16x128xf32, #tpu.memory_space<vmem>>, vector<16x128xf32>
    tpu.vector_store %arg6[%c0_18, %c0_19], %33 {strides = array<i32>} : memref<16x128xf32, #tpu.memory_space<vmem>>, vector<16x128xf32>,
    return
  }
  func.func @transform_0(%arg0: i32) -> (i32, i32) {
    %c0_i32 = arith.constant 0 : i32
    %c0_i32_0 = arith.constant 0 : i32
    return %arg0, %c0_i32 : i32, i32
  }
  func.func @transform_1(%arg0: i32) -> (i32, i32) {
    %c0_i32 = arith.constant 0 : i32
    %c0_i32_0 = arith.constant 0 : i32
    %c0_i32_1 = arith.constant 0 : i32
    return %c0_i32, %c0_i32_0 : i32, i32
  }
  func.func @transform_2(%arg0: i32) -> (i32, i32, i32) {
    %c0_i32 = arith.constant 0 : i32
    %c0_i32_0 = arith.constant 0 : i32
    %c0_i32_1 = arith.constant 0 : i32
    %c0_i32_2 = arith.constant 0 : i32
    return %c0_i32, %c0_i32_0, %c0_i32_1 : i32, i32, i32
  }
  func.func @transform_3(%arg0: i32) -> (i32, i32) {
    %c0_i32 = arith.constant 0 : i32
    %c0_i32_0 = arith.constant 0 : i32
    %c0_i32_1 = arith.constant 0 : i32
    return %c0_i32, %c0_i32_0 : i32, i32
  }
  func.func @transform_4(%arg0: i32) -> (i32, i32) {
    %c0_i32 = arith.constant 0 : i32
    %c0_i32_0 = arith.constant 0 : i32
    %c0_i32_1 = arith.constant 0 : i32
    return %c0_i32, %c0_i32_0 : i32, i32
  }
  func.func @transform_5(%arg0: i32) -> (i32, i32) {
    %c0_i32 = arith.constant 0 : i32
    %c0_i32_0 = arith.constant 0 : i32
    return %arg0, %c0_i32 : i32, i32
  }
}

</mosaic_0001>

<bundles_post_ra>
// kernel: tpu_custom_call.1
= control target key start
LH: loop header
LB: loop body
LE: loop exit
PB: predicated region body
PF: predicated region fallthrough
CT: control target
= control target key end

     0   :  { %10 = vsyncpa [#allocation3], 0  ;;  %s1432_s0 = inlined_call_operand.hbm [shape: bf16[16,64], index: 0, kind: input, shape index: {}]   ;;  %s1433_s1 = inlined_call_operand.hbm [shape: bf16[64,256], index: 1, kind: input, shape index: {}]   ;;  %s1434_s2 = inlined_call_operand.hbm [shape: bf16[2,256,256], index: 2, kind: input, shape index: {}]   ;;  %s1435_s3 = inlined_call_operand.hbm [shape: bf16[256,128], index: 3, kind: input, shape index: {}]   ;;  %s1436_s4 = inlined_call_operand.vmem [shape: f32[4,256], index: 4, kind: input, shape index: {}]   ;;  %s1437_s5 = inlined_call_operand.hbm [shape: f32[16,128], index: 5, kind: output, shape index: {}]  }
   0x1   :  { %11 = vsyncpa [#allocation6], 0 }
   0x2   :  { %12 = vsyncpa [#allocation9], 0 }
   0x3   :  { %13 = vsyncpa [#allocation4], 0  ;;  %s1289_s18 = smov [#allocation5]   ;;  %s1171_s22 = scalar_lea.hbm %s1433_s1, 1024 }
   0x4   :  { %s31_s19 = sshll.u32 %s1289_s18, 4  ;;  %p1172_p0 = scmp.ne.s32.totalorder %s1433_s1, %s1171_s22  ;;  %s32_s19 = int_to_ptr.vmem [resolvable:$true] %s31_s19 }
   0x5   :  { %p1175_p1 = scmp.lt.u32.totalorder %s1171_s22, %s1433_s1 }
   0x7   :  { %p1177_p2 = pnand %p1175_p1, %p1172_p0 }
   0x9   :  { %1180 = shalt.err (!%p1177_p2)
}
   0xa   :  { %s1181_s27 = scalar_lea.vmem %s32_s19, 1024  ;;  %p1186_p4 = scmp.lt.s32.totalorder %s32_s19, %s32_s19 }
   0xb   :  { %p1182_p3 = scmp.ne.s32.totalorder %s32_s19, %s1181_s27  ;;  %p1187_p5 = scmp.lt.s32.totalorder %s1181_s27, %s1181_s27 }
   0xd   :  { %p1188_p6 = por %p1187_p5, %p1186_p4 }
   0xf   :  { %p1189_p7 = pnand %p1188_p6, %p1182_p3 }
  0x11   :  { %1192 = shalt.err (!%p1189_p7)
}
  0x12   :  { %s1290_s28 = smov 128   ;;  %s1291_s29 = smov 8  }
  0x13   :  { %37 = dma.hbm_to_vmem [thread:$0]  %s1433_s1, 1024, %s32_s19, [#allocation6], %s1290_s28, %s1290_s28, %s1291_s29  }
  0x14   :  { %s1292_s7 = smov [#allocation2]   ;;  %s1193_s11 = scalar_lea.hbm %s1432_s0, 128 }
  0x15   :  { %s19_s8 = sshll.u32 %s1292_s7, 4  ;;  %p1194_p8 = scmp.ne.s32.totalorder %s1432_s0, %s1193_s11  ;;  %s20_s8 = int_to_ptr.vmem [resolvable:$true] %s19_s8 }
  0x16   :  { %p1197_p9 = scmp.lt.u32.totalorder %s1193_s11, %s1432_s0 }
  0x18   :  { %p1199_p10 = pnand %p1197_p9, %p1194_p8 }
  0x1a   :  { %1202 = shalt.err (!%p1199_p10)
}
  0x1b   :  { %s1203_s16 = scalar_lea.vmem %s20_s8, 128  ;;  %p1208_p12 = scmp.lt.s32.totalorder %s20_s8, %s20_s8 }
  0x1c   :  { %p1204_p11 = scmp.ne.s32.totalorder %s20_s8, %s1203_s16  ;;  %p1209_p13 = scmp.lt.s32.totalorder %s1203_s16, %s1203_s16 }
  0x1e   :  { %p1210_p0 = por %p1209_p13, %p1208_p12 }
  0x20   :  { %p1211_p1 = pnand %p1210_p0, %p1204_p11 }
  0x22   :  { %1214 = shalt.err (!%p1211_p1)
}
  0x23   :  { %s1293_s1 = smov 64   ;;  %s1294_s17 = smov 4  }
  0x24   :  { %25 = dma.hbm_to_vmem [thread:$0]  %s1432_s0, 128, %s20_s8, [#allocation3], %s1293_s1, %s1293_s1, %s1294_s17  }
  0x25   :  { %s1295_s20 = smov [#allocation7]   ;;  %s1296_s22 = smov [#allocation8]  }
  0x26   :  { %s43_s21 = sshll.u32 %s1295_s20, 4  ;;  %s55_s23 = sshll.u32 %s1296_s22, 4  ;;  %s44_s21 = int_to_ptr.vmem [resolvable:$true] %s43_s21  ;;  %s1359_s23 = int_to_ptr.vmem [resolvable:$true] %s55_s23 }
  0x27   :  { %s1215_s26 = scalar_lea.hbm %s1434_s2, 8192 }
  0x28   :  { %p1216_p2 = scmp.ne.s32.totalorder %s1434_s2, %s1215_s26  ;;  %p1219_p3 = scmp.lt.u32.totalorder %s1215_s26, %s1434_s2 }
  0x2a   :  { %p1221_p4 = pnand %p1219_p3, %p1216_p2 }
  0x2c   :  { %1224 = shalt.err (!%p1221_p4)
}
  0x2d   :  { %s1225_s0 = scalar_lea.vmem %s44_s21, 8192  ;;  %p1230_p6 = scmp.lt.s32.totalorder %s44_s21, %s44_s21 }
  0x2e   :  { %p1226_p5 = scmp.ne.s32.totalorder %s44_s21, %s1225_s0  ;;  %p1231_p7 = scmp.lt.s32.totalorder %s1225_s0, %s1225_s0 }
  0x30   :  { %p1232_p8 = por %p1231_p7, %p1230_p6 }
  0x32   :  { %p1233_p9 = pnand %p1232_p8, %p1226_p5 }
  0x34   :  { %1236 = shalt.err (!%p1233_p9)
}
  0x35   :  { %49 = dma.hbm_to_vmem [thread:$0]  %s1434_s2, 8192, %s44_s21, [#allocation6], %s1290_s28, %s1290_s28, %s1291_s29  }
  0x36   :  { %s1237_s12 = scalar_lea.hbm %s1435_s3, 2048 }
  0x37   :  { %p1238_p10 = scmp.ne.s32.totalorder %s1435_s3, %s1237_s12  ;;  %p1241_p11 = scmp.lt.u32.totalorder %s1237_s12, %s1435_s3 }
  0x39   :  { %p1243_p12 = pnand %p1241_p11, %p1238_p10 }
  0x3b   :  { %1246 = shalt.err (!%p1243_p12)
}
  0x3c   :  { %s1247_s18 = scalar_lea.vmem %s1359_s23, 2048  ;;  %p1252_p0 = scmp.lt.s32.totalorder %s1359_s23, %s1359_s23 }
  0x3d   :  { %p1248_p13 = scmp.ne.s32.totalorder %s1359_s23, %s1247_s18  ;;  %p1253_p1 = scmp.lt.s32.totalorder %s1247_s18, %s1247_s18 }
  0x3f   :  { %p1254_p2 = por %p1253_p1, %p1252_p0 }
  0x41   :  { %p1255_p3 = pnand %p1254_p2, %p1248_p13 }
  0x43   :  { %1258 = shalt.err (!%p1255_p3)
}
  0x44   :  { %61 = dma.hbm_to_vmem [thread:$0]  %s1435_s3, 2048, %s1359_s23, [#allocation9], %s1293_s1, %s1293_s1, %s1294_s17  }
  0x45   :  { %1281 = dma.done.wait [#allocation3], 128  }
  0x46   :  { %1282 = vsyncadd [#allocation3], 4294967168 }
  0x47   :  { %1283 = dma.done.wait [#allocation6], 9216  }
  0x48   :  { %1284 = vsyncadd [#allocation6], 4294958080 }
  0x49   :  { %1285 = dma.done.wait [#allocation9], 2048  }
  0x4a   :  { %1286 = vsyncadd [#allocation9], 4294965248  ;;  %v1297_v0 = vmov 0   ;;  %v1042_v1 = vld [vmem:[#allocation5 + $0x4] ss:$8 sps:$4 sm:$0xff]   ;;  %v1054_v14 = vld [vmem:[#allocation2] sm:$0xff]  }
  0x4b   :  { %188 = vmatprep.mubr.bf16.mxu0 %v1297_v0  ;;  %v1044_v2 = vld [vmem:[#allocation5] ss:$8 sps:$4 sm:$0xff]   ;;  %156 = vmatprep.subr.bf16.mxu0 %v1042_v1  ;;  %v1045_v3 = vld [vmem:[#allocation5 + $0x14] ss:$8 sps:$4 sm:$0xff]   ;;  %v1047_v4 = vld [vmem:[#allocation5 + $0x10] ss:$8 sps:$4 sm:$0xff]  }
  0x4c   :  { %157 = vmatpush1.bf16.msra.mxu0 %v1044_v2  ;;  %v1048_v5 = vld [vmem:[#allocation5 + $0x24] ss:$8 sps:$4 sm:$0xff]   ;;  %v1050_v6 = vld [vmem:[#allocation5 + $0x20] ss:$8 sps:$4 sm:$0xff]   ;;  %v1051_v9 = vld [vmem:[#allocation5 + $0x34] ss:$8 sps:$4 sm:$0xff]  }
  0x4d   :  { %158 = vmatprep.subr.bf16.mxu0 %v1045_v3  ;;  %v1055_v7 = vld [vmem:[#allocation7 + $0x4] ss:$8 sps:$4 sm:$0xff]   ;;  %v1057_v8 = vld [vmem:[#allocation7] ss:$8 sps:$4 sm:$0xff]   ;;  %v1058_v10 = vld [vmem:[#allocation7 + $0x14] ss:$8 sps:$4 sm:$0xff]  }
  0x4e   :  { %415 = vmatprep.subr.bf16.mxu1 %v1055_v7  ;;  %v1060_v11 = vld [vmem:[#allocation7 + $0x10] ss:$8 sps:$4 sm:$0xff]   ;;  %v1061_v13 = vld [vmem:[#allocation7 + $0x24] ss:$8 sps:$4 sm:$0xff]   ;;  %v1063_v15 = vld [vmem:[#allocation7 + $0x20] ss:$8 sps:$4 sm:$0xff]  }
  0x4f   :  { %416 = vmatpush1.bf16.msra.mxu1 %v1057_v8  ;;  %v1053_v12 = vld [vmem:[#allocation5 + $0x30] ss:$8 sps:$4 sm:$0xff]   ;;  %vm152_vm0 = vcmask 523264   ;;  %v1064_v16 = vld [vmem:[#allocation7 + $0x34] ss:$8 sps:$4 sm:$0xff]  }
  0x50   :  { %159 = vmatpush1.bf16.msra.mxu0 %v1047_v4  ;;  %417 = vmatprep.subr.bf16.mxu1 %v1058_v10  ;;  %v1066_v17 = vld [vmem:[#allocation7 + $0x30] ss:$8 sps:$4 sm:$0xff]   ;;  %v1067_v18 = vld [vmem:[#allocation7 + $0x44] ss:$8 sps:$4 sm:$0xff]   ;;  %v1069_v19 = vld [vmem:[#allocation7 + $0x40] ss:$8 sps:$4 sm:$0xff]  }
  0x51   :  { %160 = vmatprep.subr.bf16.mxu0 %v1048_v5  ;;  %v1070_v20 = vld [vmem:[#allocation7 + $0x54] ss:$8 sps:$4 sm:$0xff]   ;;  %v1072_v21 = vld [vmem:[#allocation7 + $0x50] ss:$8 sps:$4 sm:$0xff]   ;;  %v1073_v22 = vld [vmem:[#allocation7 + $0x64] ss:$8 sps:$4 sm:$0xff]  }
  0x52   :  { %v1075_v23 = vld [vmem:[#allocation7 + $0x60] ss:$8 sps:$4 sm:$0xff]   ;;  %v1076_v24 = vld [vmem:[#allocation7 + $0x74] ss:$8 sps:$4 sm:$0xff]   ;;  %v1078_v25 = vld [vmem:[#allocation7 + $0x70] ss:$8 sps:$4 sm:$0xff]  }
  0x53   :  { %418 = vmatpush1.bf16.msra.mxu1 %v1060_v11  ;;  %v1079_v26 = vld [vmem:[#allocation7 + $0x84] ss:$8 sps:$4 sm:$0xff]   ;;  %v1081_v27 = vld [vmem:[#allocation7 + $0x80] ss:$8 sps:$4 sm:$0xff]   ;;  %v1082_v28 = vld [vmem:[#allocation7 + $0x94] ss:$8 sps:$4 sm:$0xff]  }
  0x54   :  { %161 = vmatpush1.bf16.msra.mxu0 %v1050_v6  ;;  %419 = vmatprep.subr.bf16.mxu1 %v1061_v13  ;;  %v1084_v29 = vld [vmem:[#allocation7 + $0x90] ss:$8 sps:$4 sm:$0xff]   ;;  %v1085_v30 = vld [vmem:[#allocation7 + $0xa4] ss:$8 sps:$4 sm:$0xff]   ;;  %v1087_v31 = vld [vmem:[#allocation7 + $0xa0] ss:$8 sps:$4 sm:$0xff]   ;;  %v89_v6 = vlaneseq }
  0x55   :  { %162 = vmatprep.subr.bf16.mxu0 %v1051_v9  ;;  %v1088_v32 = vld [vmem:[#allocation7 + $0xb4] ss:$8 sps:$4 sm:$0xff]   ;;  %v1090_v33 = vld [vmem:[#allocation7 + $0xb0] ss:$8 sps:$4 sm:$0xff]   ;;  %v1091_v34 = vld [vmem:[#allocation7 + $0xc4] ss:$8 sps:$4 sm:$0xff]  }
  0x56   :  { %v1093_v35 = vld [vmem:[#allocation7 + $0xc0] ss:$8 sps:$4 sm:$0xff]   ;;  %v1094_v36 = vld [vmem:[#allocation7 + $0xd4] ss:$8 sps:$4 sm:$0xff]   ;;  %v1096_v37 = vld [vmem:[#allocation7 + $0xd0] ss:$8 sps:$4 sm:$0xff]  }
  0x57   :  { %420 = vmatpush1.bf16.msra.mxu1 %v1063_v15  ;;  %v1097_v38 = vld [vmem:[#allocation7 + $0xe4] ss:$8 sps:$4 sm:$0xff]   ;;  %v1099_v39 = vld [vmem:[#allocation7 + $0xe0] ss:$8 sps:$4 sm:$0xff]   ;;  %v1100_v40 = vld [vmem:[#allocation7 + $0xf4] ss:$8 sps:$4 sm:$0xff]  }
  0x58   :  { %163 = vmatpush1.bf16.msra.mxu0 %v1053_v12  ;;  %421 = vmatprep.subr.bf16.mxu1 %v1064_v16  ;;  %v1102_v41 = vld [vmem:[#allocation7 + $0xf0] ss:$8 sps:$4 sm:$0xff]   ;;  %v1103_v42 = vld [vmem:[#allocation7 + $0x100] ss:$8 sps:$4 sm:$0xff]   ;;  %v1105_v43 = vld [vmem:[#allocation7 + $0x104] ss:$8 sps:$4 sm:$0xff]  }
  0x59   :  { %v1108_v44 = vld [vmem:[#allocation7 + $0x114] ss:$8 sps:$4 sm:$0xff]   ;;  %675 = vmatprep.subr.bf16.mxu0 %v1105_v43  ;;  %v1106_v45 = vld [vmem:[#allocation7 + $0x110] ss:$8 sps:$4 sm:$0xff]   ;;  %v1111_v46 = vld [vmem:[#allocation7 + $0x124] ss:$8 sps:$4 sm:$0xff]  }
  0x5a   :  { %v1109_v47 = vld [vmem:[#allocation7 + $0x120] ss:$8 sps:$4 sm:$0xff]   ;;  %v1114_v48 = vld [vmem:[#allocation7 + $0x134] ss:$8 sps:$4 sm:$0xff]   ;;  %v1112_v49 = vld [vmem:[#allocation7 + $0x130] ss:$8 sps:$4 sm:$0xff]  }
  0x5b   :  { %929 = vmatmul.mubr.msk.bf16.vlgmr.msra.gmra.mrb[0].mxu0 %vm152_vm0, %v1054_v14  ;;  %422 = vmatpush1.bf16.msra.mxu1 %v1066_v17  ;;  %v1117_v50 = vld [vmem:[#allocation7 + $0x144] ss:$8 sps:$4 sm:$0xff]   ;;  %v1115_v51 = vld [vmem:[#allocation7 + $0x140] ss:$8 sps:$4 sm:$0xff]   ;;  %v1120_v52 = vld [vmem:[#allocation7 + $0x154] ss:$8 sps:$4 sm:$0xff]  }
  0x5c   :  { %423 = vmatprep.subr.bf16.mxu1 %v1067_v18  ;;  %676 = vmatpush1.bf16.msra.mxu0 %v1103_v42  ;;  %v1118_v53 = vld [vmem:[#allocation7 + $0x150] ss:$8 sps:$4 sm:$0xff]   ;;  %v1123_v54 = vld [vmem:[#allocation7 + $0x164] ss:$8 sps:$4 sm:$0xff]   ;;  %v1121_v55 = vld [vmem:[#allocation7 + $0x160] ss:$8 sps:$4 sm:$0xff]  }
  0x5d   :  { %677 = vmatprep.subr.bf16.mxu0 %v1108_v44  ;;  %v1126_v56 = vld [vmem:[#allocation7 + $0x174] ss:$8 sps:$4 sm:$0xff]   ;;  %v1124_v57 = vld [vmem:[#allocation7 + $0x170] ss:$8 sps:$4 sm:$0xff]   ;;  %v1129_v58 = vld [vmem:[#allocation7 + $0x184] ss:$8 sps:$4 sm:$0xff]  }
  0x5e   :  { %v1127_v59 = vld [vmem:[#allocation7 + $0x180] ss:$8 sps:$4 sm:$0xff]   ;;  %v1132_v60 = vld [vmem:[#allocation7 + $0x194] ss:$8 sps:$4 sm:$0xff]   ;;  %v1130_v61 = vld [vmem:[#allocation7 + $0x190] ss:$8 sps:$4 sm:$0xff]  }
  0x5f   :  { %424 = vmatpush1.bf16.msra.mxu1 %v1069_v19  ;;  %v1135_v62 = vld [vmem:[#allocation7 + $0x1a4] ss:$8 sps:$4 sm:$0xff]   ;;  %v1133_v63 = vld [vmem:[#allocation7 + $0x1a0] ss:$8 sps:$4 sm:$0xff]   ;;  %v1138_v0 = vld [vmem:[#allocation7 + $0x1b4] ss:$8 sps:$4 sm:$0xff]  }
  0x60   :  { %425 = vmatprep.subr.bf16.mxu1 %v1070_v20  ;;  %678 = vmatpush1.bf16.msra.mxu0 %v1106_v45  ;;  %v1136_v1 = vld [vmem:[#allocation7 + $0x1b0] ss:$8 sps:$4 sm:$0xff]   ;;  %v1141_v2 = vld [vmem:[#allocation7 + $0x1c4] ss:$8 sps:$4 sm:$0xff]   ;;  %v1139_v3 = vld [vmem:[#allocation7 + $0x1c0] ss:$8 sps:$4 sm:$0xff]  }
  0x61   :  { %679 = vmatprep.subr.bf16.mxu0 %v1111_v46  ;;  %v1144_v4 = vld [vmem:[#allocation7 + $0x1d4] ss:$8 sps:$4 sm:$0xff]   ;;  %v1142_v5 = vld [vmem:[#allocation7 + $0x1d0] ss:$8 sps:$4 sm:$0xff]   ;;  %v1396_v7 = vshrl.u32 %v89_v6, 7  ;;  %v1160_v42 = vld [vmem:[#allocation8 + $0x20] sm:$0xff]  }
  0x62   :  { %v1402_v9 = vld [vmem:[%s1436_s4] sm:$0xff]  ;;  %v1161_v43 = vld [vmem:[#allocation8 + $0x68] sm:$0xff]   ;;  %s1298_s4 = smov [#allocation10]  }
  0x63   :  { %426 = vmatpush1.bf16.msra.mxu1 %v1072_v21  ;;  %v91_v8 = vsub.s32 0, %v1396_v7  ;;  %v95_v10 = vsub.s32 4, %v1396_v7  ;;  %v239_v44 = vsub.s32 1, %v1396_v7  ;;  %v243_v45 = vsub.s32 5, %v1396_v7  ;;  %s906_s17 = sshll.u32 %s1298_s4, 4  ;;  %s907_s17 = int_to_ptr.vmem [resolvable:$true] %s906_s17 }
  0x64   :  { %427 = vmatprep.subr.bf16.mxu1 %v1073_v22  ;;  %680 = vmatpush1.bf16.msra.mxu0 %v1109_v47  ;;  %v503_v6 = vsub.s32 6, %v1396_v7  ;;  %s1259_s20 = scalar_lea.vmem %s907_s17, 256  ;;  %p1264_p5 = scmp.lt.s32.totalorder %s907_s17, %s907_s17 }
  0x65   :  { %681 = vmatprep.subr.bf16.mxu0 %v1114_v48  ;;  %v92_v11 = vrot.slane %v1402_v9, %v91_v8  ;;  %v96_v12 = vrot.slane %v1402_v9, %v95_v10  ;;  %v240_v46 = vrot.slane %v1402_v9, %v239_v44  ;;  %v244_v47 = vrot.slane %v1402_v9, %v243_v45  ;;  %p1260_p4 = scmp.ne.s32.totalorder %s907_s17, %s1259_s20  ;;  %p1265_p6 = scmp.lt.s32.totalorder %s1259_s20, %s1259_s20 }
  0x66   :  { %v504_v10 = vrot.slane %v1402_v9, %v503_v6 }
  0x67   :  { %428 = vmatpush1.bf16.msra.mxu1 %v1075_v23  ;;  %v102_v13 = vrot.slane %v92_v11, %v91_v8  ;;  %v106_v14 = vrot.slane %v96_v12, %v91_v8  ;;  %v250_v48 = vrot.slane %v240_v46, %v239_v44  ;;  %p1266_p7 = por %p1265_p6, %p1264_p5 }
  0x68   :  { %429 = vmatprep.subr.bf16.mxu1 %v1076_v24  ;;  %682 = vmatpush1.bf16.msra.mxu0 %v1112_v49  ;;  %v254_v49 = vrot.slane %v244_v47, %v239_v44 }
  0x69   :  { %683 = vmatprep.subr.bf16.mxu0 %v1117_v50  ;;  %p1267_p8 = pnand %p1266_p7, %p1260_p4 }
  0x6b   :  { %430 = vmatpush1.bf16.msra.mxu1 %v1078_v25 }
  0x6c   :  { %431 = vmatprep.subr.bf16.mxu1 %v1079_v26  ;;  %684 = vmatpush1.bf16.msra.mxu0 %v1115_v51 }
  0x6d   :  { %685 = vmatprep.subr.bf16.mxu0 %v1120_v52 }
  0x6f   :  { %432 = vmatpush1.bf16.msra.mxu1 %v1081_v27 }
  0x70   :  { %433 = vmatprep.subr.bf16.mxu1 %v1082_v28  ;;  %686 = vmatpush1.bf16.msra.mxu0 %v1118_v53 }
  0x71   :  { %687 = vmatprep.subr.bf16.mxu0 %v1123_v54 }
  0x73   :  { %434 = vmatpush1.bf16.msra.mxu1 %v1084_v29  ;;  %v1147_v29 = vld [vmem:[#allocation7 + $0x1e4] ss:$8 sps:$4 sm:$0xff]  }
  0x74   :  { %435 = vmatprep.subr.bf16.mxu1 %v1085_v30  ;;  %688 = vmatpush1.bf16.msra.mxu0 %v1121_v55  ;;  %v1145_v30 = vld [vmem:[#allocation7 + $0x1e0] ss:$8 sps:$4 sm:$0xff]  }
  0x75   :  { %689 = vmatprep.subr.bf16.mxu0 %v1126_v56 }
  0x77   :  { %436 = vmatpush1.bf16.msra.mxu1 %v1087_v31  ;;  %v1150_v31 = vld [vmem:[#allocation7 + $0x1f4] ss:$8 sps:$4 sm:$0xff]  }
  0x78   :  { %437 = vmatprep.subr.bf16.mxu1 %v1088_v32  ;;  %690 = vmatpush1.bf16.msra.mxu0 %v1124_v57  ;;  %v1148_v32 = vld [vmem:[#allocation7 + $0x1f0] ss:$8 sps:$4 sm:$0xff]  }
  0x79   :  { %691 = vmatprep.subr.bf16.mxu0 %v1129_v58 }
  0x7b   :  { %438 = vmatpush1.bf16.msra.mxu1 %v1090_v33  ;;  %v1151_v33 = vld [vmem:[#allocation8 + $0x40] sm:$0xff]  }
  0x7c   :  { %439 = vmatprep.subr.bf16.mxu1 %v1091_v34  ;;  %692 = vmatpush1.bf16.msra.mxu0 %v1127_v59  ;;  %v1152_v34 = vld [vmem:[#allocation8] sm:$0xff]  }
  0x7d   :  { %693 = vmatprep.subr.bf16.mxu0 %v1132_v60 }
  0x7f   :  { %440 = vmatpush1.bf16.msra.mxu1 %v1093_v35  ;;  %v1153_v35 = vld [vmem:[#allocation8 + $0x48] sm:$0xff]  }
  0x80   :  { %441 = vmatprep.subr.bf16.mxu1 %v1094_v36  ;;  %694 = vmatpush1.bf16.msra.mxu0 %v1130_v61  ;;  %v1154_v36 = vld [vmem:[#allocation8 + $0x8] sm:$0xff]  }
  0x81   :  { %695 = vmatprep.subr.bf16.mxu0 %v1135_v62 }
  0x83   :  { %442 = vmatpush1.bf16.msra.mxu1 %v1096_v37  ;;  %v1155_v37 = vld [vmem:[#allocation8 + $0x50] sm:$0xff]  }
  0x84   :  { %443 = vmatprep.subr.bf16.mxu1 %v1097_v38  ;;  %696 = vmatpush1.bf16.msra.mxu0 %v1133_v63  ;;  %v1156_v38 = vld [vmem:[#allocation8 + $0x10] sm:$0xff]  }
  0x85   :  { %697 = vmatprep.subr.bf16.mxu0 %v1138_v0  ;;  %v1162_v0 = vld [vmem:[#allocation8 + $0x28] sm:$0xff]  }
  0x87   :  { %444 = vmatpush1.bf16.msra.mxu1 %v1099_v39  ;;  %v1157_v39 = vld [vmem:[#allocation8 + $0x58] sm:$0xff]  }
  0x88   :  { %445 = vmatprep.subr.bf16.mxu1 %v1100_v40  ;;  %698 = vmatpush1.bf16.msra.mxu0 %v1136_v1  ;;  %v1158_v40 = vld [vmem:[#allocation8 + $0x18] sm:$0xff]   ;;  %v1163_v1 = vld [vmem:[#allocation8 + $0x70] sm:$0xff]  }
  0x89   :  { %699 = vmatprep.subr.bf16.mxu0 %v1141_v2  ;;  %v1164_v2 = vld [vmem:[#allocation8 + $0x30] sm:$0xff]  }
  0x8b   :  { %446 = vmatpush1.bf16.msra.mxu1 %v1102_v41  ;;  %v1159_v41 = vld [vmem:[#allocation8 + $0x60] sm:$0xff]  }
  0x8c   :  { %700 = vmatpush1.bf16.msra.mxu0 %v1139_v3  ;;  %1010 = vmatprep.subr.bf16.mxu1 %v1151_v33  ;;  %v1165_v3 = vld [vmem:[#allocation8 + $0x78] sm:$0xff]  }
  0x8d   :  { %701 = vmatprep.subr.bf16.mxu0 %v1144_v4  ;;  %v1166_v4 = vld [vmem:[#allocation8 + $0x38] sm:$0xff]  }
  0x90   :  { %702 = vmatpush1.bf16.msra.mxu0 %v1142_v5  ;;  %v499_v5 = vsub.s32 2, %v1396_v7 }
  0x91   :  { %703 = vmatprep.subr.bf16.mxu0 %v1147_v29 }
  0x92   :  { %v500_v8 = vrot.slane %v1402_v9, %v499_v5  ;;  %v514_v12 = vrot.slane %v504_v10, %v499_v5 }
  0x94   :  { %704 = vmatpush1.bf16.msra.mxu0 %v1145_v30  ;;  %v510_v11 = vrot.slane %v500_v8, %v499_v5 }
  0x95   :  { %705 = vmatprep.subr.bf16.mxu0 %v1150_v31 }
  0x98   :  { %706 = vmatpush1.bf16.msra.mxu0 %v1148_v32 }
 0x12e   :  { %v190_v15 = vpop.f32.mrb[0].mxu0 }
 0x12f   :  { %v191_v16 = vadd.f32 %v190_v15, %v102_v13  ;;  %v192_v17 = vpop.f32.mrb[1].mxu0 }
 0x130   :  { %v193_v18 = vadd.f32 %v192_v17, %v106_v14  ;;  %v194_v19 = vpop.f32.mrb[2].mxu0 }
 0x131   :  { %v195_v20 = vadd.f32 %v194_v19, %v102_v13  ;;  %v196_v21 = vpop.f32.mrb[3].mxu0  ;;  %v199_v23 = vmax.f32 %v191_v16, 0.0 }
 0x132   :  { %v197_v22 = vadd.f32 %v196_v21, %v106_v14  ;;  %v200_v25 = vmax.f32 %v193_v18, 0.0 }
 0x133   :  { %v201_v24 = vmax.f32 %v195_v20, 0.0 }
 0x134   :  { %v202_v26 = vmax.f32 %v197_v22, 0.0 }
 0x135   :  { %v203_v27 = vpack.c.bf16 %v201_v24, %v199_v23 }
 0x136   :  { %v204_v28 = vpack.c.bf16 %v202_v26, %v200_v25 }
 0x138   :  { %447 = vmatprep.mubr.bf16.mxu1 %v204_v28 }
 0x139   :  { %448 = vmatmul.mubr.bf16.vlgmr.msra.gmra.mrb[0].mxu1 %v203_v27  ;;  %v758_v27 = vsub.s32 3, %v1396_v7 }
 0x13a   :  { %1011 = vmatpush3.bf16.msra.mxu1 %v1152_v34 }
 0x13b   :  { %1012 = vmatprep.subr.bf16.mxu1 %v1153_v35  ;;  %v759_v29 = vrot.slane %v1402_v9, %v758_v27 }
 0x13e   :  { %1013 = vmatpush3.bf16.msra.mxu1 %v1154_v36 }
 0x13f   :  { %1014 = vmatprep.subr.bf16.mxu1 %v1155_v37 }
 0x142   :  { %1015 = vmatpush3.bf16.msra.mxu1 %v1156_v38 }
 0x143   :  { %1016 = vmatprep.subr.bf16.mxu1 %v1157_v39 }
 0x146   :  { %1017 = vmatpush3.bf16.msra.mxu1 %v1158_v40 }
 0x147   :  { %1018 = vmatprep.subr.bf16.mxu1 %v1159_v41 }
 0x14a   :  { %1019 = vmatpush3.bf16.msra.mxu1 %v1160_v42 }
 0x14b   :  { %1020 = vmatprep.subr.bf16.mxu1 %v1161_v43 }
 0x14e   :  { %1021 = vmatpush3.bf16.msra.mxu1 %v1162_v0 }
 0x14f   :  { %1022 = vmatprep.subr.bf16.mxu1 %v1163_v1 }
 0x152   :  { %1023 = vmatpush3.bf16.msra.mxu1 %v1164_v2 }
 0x153   :  { %1024 = vmatprep.subr.bf16.mxu1 %v1165_v3 }
 0x156   :  { %1025 = vmatpush3.bf16.msra.mxu1 %v1166_v4 }
 0x20c   :  { %v449_v50 = vpop.f32.mrb[0].mxu1 }
 0x20d   :  { %v450_v51 = vadd.f32 %v449_v50, %v250_v48  ;;  %v451_v52 = vpop.f32.mrb[1].mxu1 }
 0x20e   :  { %v452_v53 = vadd.f32 %v451_v52, %v254_v49  ;;  %v453_v54 = vpop.f32.mrb[2].mxu1 }
 0x20f   :  { %v454_v55 = vadd.f32 %v453_v54, %v250_v48  ;;  %v455_v56 = vpop.f32.mrb[3].mxu1  ;;  %v458_v58 = vmax.f32 %v450_v51, 0.0 }
 0x210   :  { %v456_v57 = vadd.f32 %v455_v56, %v254_v49  ;;  %v459_v60 = vmax.f32 %v452_v53, 0.0 }
 0x211   :  { %v460_v59 = vmax.f32 %v454_v55, 0.0 }
 0x212   :  { %v461_v61 = vmax.f32 %v456_v57, 0.0 }
 0x213   :  { %v462_v62 = vpack.c.bf16 %v460_v59, %v458_v58 }
 0x214   :  { %v463_v63 = vpack.c.bf16 %v461_v61, %v459_v60 }
 0x216   :  { %707 = vmatprep.mubr.bf16.mxu0 %v463_v63 }
 0x217   :  { %708 = vmatmul.mubr.bf16.vlgmr.msra.gmra.mrb[4].mxu0 %v462_v62 }
 0x2ea   :  { %v709_v13 = vpop.f32.mrb[4].mxu0 }
 0x2eb   :  { %v710_v14 = vadd.f32 %v709_v13, %v510_v11  ;;  %v711_v15 = vpop.f32.mrb[5].mxu0 }
 0x2ec   :  { %v712_v16 = vadd.f32 %v711_v15, %v514_v12  ;;  %v713_v17 = vpop.f32.mrb[6].mxu0 }
 0x2ed   :  { %v714_v18 = vadd.f32 %v713_v17, %v510_v11  ;;  %v715_v19 = vpop.f32.mrb[7].mxu0  ;;  %v718_v21 = vmax.f32 %v710_v14, 0.0 }
 0x2ee   :  { %v716_v20 = vadd.f32 %v715_v19, %v514_v12  ;;  %v719_v23 = vmax.f32 %v712_v16, 0.0 }
 0x2ef   :  { %v720_v22 = vmax.f32 %v714_v18, 0.0 }
 0x2f0   :  { %v721_v24 = vmax.f32 %v716_v20, 0.0 }
 0x2f1   :  { %v722_v25 = vpack.c.bf16 %v720_v22, %v718_v21 }
 0x2f2   :  { %v723_v26 = vpack.c.bf16 %v721_v24, %v719_v23 }
 0x2f4   :  { %888 = vmatprep.mubr.bf16.mxu1 %v723_v26 }
 0x2f5   :  { %889 = vmatmul.mubr.bf16.vlgmr.msra.gmra.mrb[4].mxu1 %v722_v25 }
 0x3c8   :  { %v1026_v28 = vpop.f32.mrb[4].mxu1 }
 0x3c9   :  { %v1027_v30 = vpop.f32.mrb[5].mxu1 }
 0x3ca   :  { %v1028_v31 = vadd.f32 %v1027_v30, %v1026_v28  ;;  %v1029_v32 = vpop.f32.mrb[6].mxu1 }
 0x3cb   :  { %v1030_v33 = vpop.f32.mrb[7].mxu1 }
 0x3cc   :  { %v891_v34 = vadd.f32 %v1028_v31, %v759_v29  ;;  %v1031_v35 = vadd.f32 %v1030_v33, %v1029_v32 }
 0x3ce   :  { %1167 = vtanh.f32 %v891_v34  ;;  %v894_v36 = vadd.f32 %v1031_v35, %v759_v29 }
 0x3d0   :  { %1169 = vtanh.f32 %v894_v36 }
 0x3d8   :  { %v1168_v37 = vpop.eup %1167 }
 0x3d9   :  { %899 = vst [vmem:[#allocation10] sm:$0xff] %v1168_v37 }
 0x3da   :  { %v1170_v38 = vpop.eup %1169 }
 0x3db   :  { %900 = vst [vmem:[#allocation10 + $0x8] sm:$0xff] %v1170_v38 }
 0x3dc   :  { %1270 = shalt.err (!%p1267_p8)
}
 0x3dd   :  { %s1271_s23 = scalar_lea.hbm %s1437_s5, 256 }
 0x3de   :  { %p1272_p9 = scmp.ne.s32.totalorder %s1437_s5, %s1271_s23  ;;  %p1275_p10 = scmp.lt.u32.totalorder %s1271_s23, %s1437_s5 }
 0x3e0   :  { %p1277_p11 = pnand %p1275_p10, %p1272_p9 }
 0x3e2   :  { %1280 = shalt.err (!%p1277_p11)
}
 0x3e3   :  { %912 = dma.vmem_to_hbm [thread:$0]  %s907_s17, 256, %s1437_s5, [#allocation4], %s1290_s28, %s1290_s28, %s1291_s29  }
 0x3e4   :  { %1287 = dma.done.wait [#allocation4], 256  }
 0x3e5   :  { %1288 = vsyncadd [#allocation4], 4294967040 }
 0x3e6   :  { %916 = vsyncpa [#allocation3], 1 }
 0x3e7   :  { %917 = vsyncpa [#allocation6], 1 }
 0x3e8   :  { %918 = vsyncpa [#allocation9], 1 }
 0x3e9   :  { %919 = vsyncpa [#allocation4], 1 }

</bundles_post_ra>
